<compile_context>
chip_gen: v7x
topology: tpu7x:2x2x1
jax: 0.10.0
libtpu: 0.0.40
codegen_flags: <defaults>
</compile_context>

<pallas_src>
import functools
import math

import jax
import jax.numpy as jnp
from jax import lax
from jax.experimental import pallas as pl
from jax.experimental.pallas import tpu as pltpu


D_IN, D_H1, D_H2, D_OUT = 20, 64, 32, 16

_LANE = 128
# Lane-padded f32 bytes per batch row resident in VMEM for the input and
# output blocks (20 -> 128 lanes, 16 -> 128 lanes), each double-buffered.
_BLOCK_BYTES_PER_ROW = 2 * (_LANE * 4) * 2
_VMEM_BLOCK_BUDGET = 24 * 1024 * 1024      # keeps v7x (64 MiB physical) happy
_VMEM_LIMIT_BYTES = 32 * 1024 * 1024       # explicit: above v5e's 16 MiB default


def mixmlp_kernel(x_ref, w1_ref, b1_ref, w2_ref, b2_ref, w3_ref, b3_ref, o_ref,
                  *, chunk_b, n_chunks, unroll):
    # Tiny weights: a handful of vregs, loaded once per grid step.
    w1 = w1_ref[...]            # (20, 64) bf16
    w2 = w2_ref[...]            # (64, 32) bf16
    w3 = w3_ref[...]            # (32, 16) bf16
    # Bias rows hoisted out of the chunk loop (JAX does not CSE
    # broadcast_in_dim); the (1, N) row broadcasts along sublanes in the add,
    # which is cheap in this batch-major layout.
    b1 = b1_ref[...]            # (1, 64) f32
    b2 = b2_ref[...]            # (1, 32) f32
    b3 = b3_ref[...]            # (1, 16) f32

    def body(c, carry):
        start = pl.multiple_of(c * chunk_b, chunk_b)
        xc = x_ref[pl.ds(start, chunk_b), :].astype(jnp.bfloat16)       # (chunk, 20)
        h1 = jnp.dot(xc, w1, preferred_element_type=jnp.float32) + b1   # (chunk, 64)
        h1 = jnp.maximum(h1, 0.0).astype(jnp.bfloat16)
        h2 = jnp.dot(h1, w2, preferred_element_type=jnp.float32) + b2   # (chunk, 32)
        h2 = jnp.maximum(h2, 0.0).astype(jnp.bfloat16)
        y = jnp.dot(h2, w3, preferred_element_type=jnp.float32) + b3    # (chunk, 16)
        o_ref[pl.ds(start, chunk_b), :] = y.astype(o_ref.dtype)
        return carry

    lax.fori_loop(0, n_chunks, body, None, unroll=unroll)


def mixmlp_forward(x, params, *, tile_b=8192, chunk_b=256, unroll=1,
                   out_dtype=jnp.float32):
    """x: (B, 20) float32. params: PyTorch-layout weights (out, in), biases (out,)."""
    B, d_in = x.shape
    assert d_in == D_IN

    # Only the few-KB weights get a wrapper-side transpose/cast (negligible);
    # the activation streams go through zero extra XLA passes.
    w1 = params["w1"].T.astype(jnp.bfloat16)                # (20, 64)
    w2 = params["w2"].T.astype(jnp.bfloat16)                # (64, 32)
    w3 = params["w3"].T.astype(jnp.bfloat16)                # (32, 16)
    b1 = params["b1"].reshape(1, D_H1).astype(jnp.float32)
    b2 = params["b2"].reshape(1, D_H2).astype(jnp.float32)
    b3 = params["b3"].reshape(1, D_OUT).astype(jnp.float32)

    # ---- Batch-tile selection ---------------------------------------------
    # Large tiles amortize the per-grid-step overhead, capped by (a) a VMEM
    # budget for the double-buffered lane-padded in/out blocks and (b) a
    # ">=2 grid steps" cap so v7x's two TensorCores both get work.
    tile_b = pl.cdiv(max(tile_b, _LANE), _LANE) * _LANE
    vmem_cap = (_VMEM_BLOCK_BUDGET // _BLOCK_BYTES_PER_ROW) // _LANE * _LANE
    two_step_cap = max(_LANE, pl.cdiv(B, 2 * _LANE) * _LANE)
    tile_b = min(tile_b, vmem_cap, two_step_cap)

    chunk_b = min(chunk_b, tile_b)
    if tile_b % chunk_b != 0:
        chunk_b = _LANE
    n_chunks = tile_b // chunk_b

    grid = (pl.cdiv(B, tile_b),)
    kernel = functools.partial(mixmlp_kernel, chunk_b=chunk_b,
                               n_chunks=n_chunks, unroll=unroll)

    in_specs = [
        # Activation tile in its native (batch, feature) layout.
        pl.BlockSpec((tile_b, D_IN), lambda i: (i, 0)),
        # Whole-array weight/bias blocks with constant index_map (~15 KB total).
        pl.BlockSpec((D_IN, D_H1), lambda i: (0, 0)),
        pl.BlockSpec((1, D_H1), lambda i: (0, 0)),
        pl.BlockSpec((D_H1, D_H2), lambda i: (0, 0)),
        pl.BlockSpec((1, D_H2), lambda i: (0, 0)),
        pl.BlockSpec((D_H2, D_OUT), lambda i: (0, 0)),
        pl.BlockSpec((1, D_OUT), lambda i: (0, 0)),
    ]
    out_specs = pl.BlockSpec((tile_b, D_OUT), lambda i: (i, 0))

    flops = 2 * B * (D_IN * D_H1 + D_H1 * D_H2 + D_H2 * D_OUT)
    weight_bytes = (2 * (D_H1 * D_IN + D_H2 * D_H1 + D_OUT * D_H2)
                    + 4 * (D_H1 + D_H2 + D_OUT))
    bytes_accessed = (B * (4 * D_IN + jnp.dtype(out_dtype).itemsize * D_OUT)
                      + weight_bytes)

    return pl.pallas_call(
        kernel,
        out_shape=jax.ShapeDtypeStruct((B, D_OUT), out_dtype),
        grid=grid,
        in_specs=in_specs,
        out_specs=out_specs,
        compiler_params=pltpu.CompilerParams(
            dimension_semantics=("parallel",),
            vmem_limit_bytes=_VMEM_LIMIT_BYTES),
        cost_estimate=pl.CostEstimate(
            flops=flops, transcendentals=0, bytes_accessed=bytes_accessed),
    )(x, w1, b1, w2, b2, w3, b3)


def init_params(key):
    """Deterministic init mirroring nn.Linear: weights (out, in), biases (out,)."""
    def linear_init(k, fan_in, fan_out):
        kw, kb = jax.random.split(k)
        bound = 1.0 / math.sqrt(fan_in)
        w = jax.random.uniform(kw, (fan_out, fan_in), jnp.float32, -bound, bound)
        b = jax.random.uniform(kb, (fan_out,), jnp.float32, -bound, bound)
        return w, b

    k1, k2, k3 = jax.random.split(key, 3)
    w1, b1 = linear_init(k1, D_IN, D_H1)
    w2, b2 = linear_init(k2, D_H1, D_H2)
    w3, b3 = linear_init(k3, D_H2, D_OUT)
    return {"w1": w1, "b1": b1, "w2": w2, "b2": b2, "w3": w3, "b3": b3}


def mixmlp_reference_f32(x, p):
    h1 = jnp.maximum(x @ p["w1"].T + p["b1"], 0.0)
    h2 = jnp.maximum(h1 @ p["w2"].T + p["b2"], 0.0)
    return h2 @ p["w3"].T + p["b3"]


def mixmlp_reference_bf16(x, p):
    # Mirrors the kernel's numerics: bf16 matmul inputs, f32 accumulation.
    xb = x.astype(jnp.bfloat16)
    w1 = p["w1"].astype(jnp.bfloat16)
    w2 = p["w2"].astype(jnp.bfloat16)
    w3 = p["w3"].astype(jnp.bfloat16)
    h1 = jnp.dot(xb, w1.T, preferred_element_type=jnp.float32) + p["b1"]
    h1 = jnp.maximum(h1, 0.0).astype(jnp.bfloat16)
    h2 = jnp.dot(h1, w2.T, preferred_element_type=jnp.float32) + p["b2"]
    h2 = jnp.maximum(h2, 0.0).astype(jnp.bfloat16)
    return jnp.dot(h2, w3.T, preferred_element_type=jnp.float32) + p["b3"]


if __name__ == "__main__":
    key = jax.random.PRNGKey(0)
    kx1, kx2, kx3, kp = jax.random.split(key, 4)
    params = init_params(kp)

    # Case 1: clamp yields tile_b=256, grid=(2,) -> >=2 steps (v7x megacore path).
    B1 = 512
    x1 = jax.random.normal(kx1, (B1, D_IN), dtype=jnp.float32)
    out1 = jax.block_until_ready(mixmlp_forward(x1, params))
    assert out1.shape == (B1, D_OUT)
    assert jnp.allclose(out1, mixmlp_reference_bf16(x1, params), atol=1e-3, rtol=1e-3)
    # Sanity vs. full-f32 module semantics (bf16 matmul inputs => loose atol).
    assert float(jnp.max(jnp.abs(out1 - mixmlp_reference_f32(x1, params)))) < 5e-2

    # Case 2: batch not a multiple of the tile (partial-block padding + masked
    # writeback on the last grid step).
    B2 = 200
    x2 = jax.random.normal(kx2, (B2, D_IN), dtype=jnp.float32)
    out2 = jax.block_until_ready(mixmlp_forward(x2, params))
    assert out2.shape == (B2, D_OUT)
    assert jnp.allclose(out2, mixmlp_reference_bf16(x2, params), atol=1e-3, rtol=1e-3)

    # Case 3: explicit tile/chunk so the in-kernel chunk loop runs >1 iteration
    # with a bounded unroll.
    B3 = 1024
    x3 = jax.random.normal(kx3, (B3, D_IN), dtype=jnp.float32)
    out3 = jax.block_until_ready(
        mixmlp_forward(x3, params, tile_b=512, chunk_b=128, unroll=2))
    assert out3.shape == (B3, D_OUT)
    assert jnp.allclose(out3, mixmlp_reference_bf16(x3, params), atol=1e-3, rtol=1e-3)

    print("KERNEL_OK")
</pallas_src>

<mosaic_0001>
module attributes {stable_mosaic.version = 11 : i64} {
  func.func @mixmlp_kernel(%arg0: i32, %arg1: memref<256x20xf32, #tpu.memory_space<vmem>>, %arg2: memref<20x64xbf16, #tpu.memory_space<vmem>>, %arg3: memref<1x64xf32, #tpu.memory_space<vmem>>, %arg4: memref<64x32xbf16, #tpu.memory_space<vmem>>, %arg5: memref<1x32xf32, #tpu.memory_space<vmem>>, %arg6: memref<32x16xbf16, #tpu.memory_space<vmem>>, %arg7: memref<1x16xf32, #tpu.memory_space<vmem>>, %arg8: memref<256x16xf32, #tpu.memory_space<vmem>>) attributes {dimension_semantics = [#tpu.dimension_semantics<parallel>], iteration_bounds = array<i64: 2>, scalar_prefetch = 0 : i64, scratch_operands = 0 : i64, tpu.core_type = #tpu.core_type<tc>, window_params = [{transform_indices = @transform_0, window_bounds = array<i64: 256, 20>}, {pipeline_mode = #tpu.pipeline_mode<synchronous>, transform_indices = @transform_1, window_bounds = array<i64: 20, 64>}, {pipeline_mode = #tpu.pipeline_mode<synchronous>, transform_indices = @transform_2, window_bounds = array<i64: 1, 64>}, {pipeline_mode = #tpu.pipeline_mode<synchronous>, transform_indices = @transform_3, window_bounds = array<i64: 64, 32>}, {pipeline_mode = #tpu.pipeline_mode<synchronous>, transform_indices = @transform_4, window_bounds = array<i64: 1, 32>}, {pipeline_mode = #tpu.pipeline_mode<synchronous>, transform_indices = @transform_5, window_bounds = array<i64: 32, 16>}, {pipeline_mode = #tpu.pipeline_mode<synchronous>, transform_indices = @transform_6, window_bounds = array<i64: 1, 16>}, {transform_indices = @transform_7, window_bounds = array<i64: 256, 16>}]} {
    %c0 = arith.constant 0 : index
    %c0_0 = arith.constant 0 : index
    %0 = vector.load %arg2[%c0, %c0_0] : memref<20x64xbf16, #tpu.memory_space<vmem>>, vector<20x64xbf16>
    %c0_1 = arith.constant 0 : index
    %c0_2 = arith.constant 0 : index
    %1 = vector.load %arg4[%c0_1, %c0_2] : memref<64x32xbf16, #tpu.memory_space<vmem>>, vector<64x32xbf16>
    %c0_3 = arith.constant 0 : index
    %c0_4 = arith.constant 0 : index
    %2 = vector.load %arg6[%c0_3, %c0_4] : memref<32x16xbf16, #tpu.memory_space<vmem>>, vector<32x16xbf16>
    %c0_5 = arith.constant 0 : index
    %c0_6 = arith.constant 0 : index
    %3 = vector.load %arg3[%c0_5, %c0_6] : memref<1x64xf32, #tpu.memory_space<vmem>>, vector<1x64xf32>
    %c0_7 = arith.constant 0 : index
    %c0_8 = arith.constant 0 : index
    %4 = vector.load %arg5[%c0_7, %c0_8] : memref<1x32xf32, #tpu.memory_space<vmem>>, vector<1x32xf32>
    %c0_9 = arith.constant 0 : index
    %c0_10 = arith.constant 0 : index
    %5 = vector.load %arg7[%c0_9, %c0_10] : memref<1x16xf32, #tpu.memory_space<vmem>>, vector<1x16xf32>
    %c0_i32 = arith.constant 0 : i32
    %c256_i32 = arith.constant 256 : i32
    %6 = arith.muli %c0_i32, %c256_i32 : i32
    %7 = tpu.assume_multiple %6, 256 : i32
    %8 = arith.index_cast %7 : i32 to index
    %c0_11 = arith.constant 0 : index
    %9 = vector.load %arg1[%8, %c0_11] : memref<256x20xf32, #tpu.memory_space<vmem>>, vector<256x20xf32>
    %10 = arith.truncf %9 : vector<256x20xf32> to vector<256x20xbf16>
    %cst = arith.constant dense<0.000000e+00> : vector<256x64xf32>
    %11 = tpu.matmul %10, %0, %cst {dimension_numbers = #tpu.dot_dimension_numbers<[1], [0], [0], [1], [0, 0, 1, 1], [], []>} : vector<256x20xbf16>, vector<20x64xbf16>, vector<256x64xf32> -> vector<256x64xf32>
    %12 = vector.broadcast %3 : vector<1x64xf32> to vector<256x64xf32>
    %13 = arith.addf %11, %12 : vector<256x64xf32>
    %cst_12 = arith.constant 0.000000e+00 : f32
    %14 = vector.broadcast %cst_12 : f32 to vector<256x64xf32>
    %15 = arith.maximumf %13, %14 : vector<256x64xf32>
    %16 = arith.truncf %15 : vector<256x64xf32> to vector<256x64xbf16>
    %cst_13 = arith.constant dense<0.000000e+00> : vector<256x32xf32>
    %17 = tpu.matmul %16, %1, %cst_13 {dimension_numbers = #tpu.dot_dimension_numbers<[1], [0], [0], [1], [0, 0, 1, 1], [], []>} : vector<256x64xbf16>, vector<64x32xbf16>, vector<256x32xf32> -> vector<256x32xf32>
    %18 = vector.broadcast %4 : vector<1x32xf32> to vector<256x32xf32>
    %19 = arith.addf %17, %18 : vector<256x32xf32>
    %cst_14 = arith.constant 0.000000e+00 : f32
    %20 = vector.broadcast %cst_14 : f32 to vector<256x32xf32>
    %21 = arith.maximumf %19, %20 : vector<256x32xf32>
    %22 = arith.truncf %21 : vector<256x32xf32> to vector<256x32xbf16>
    %cst_15 = arith.constant dense<0.000000e+00> : vector<256x16xf32>
    %23 = tpu.matmul %22, %2, %cst_15 {dimension_numbers = #tpu.dot_dimension_numbers<[1], [0], [0], [1], [0, 0, 1, 1], [], []>} : vector<256x32xbf16>, vector<32x16xbf16>, vector<256x16xf32> -> vector<256x16xf32>
    %24 = vector.broadcast %5 : vector<1x16xf32> to vector<256x16xf32>
    %25 = arith.addf %23, %24 : vector<256x16xf32>
    %26 = arith.index_cast %7 : i32 to index
    %c0_16 = arith.constant 0 : index
    %27 = vector.load %arg8[%26, %c0_16] : memref<256x16xf32, #tpu.memory_space<vmem>>, vector<256x16xf32>
    tpu.vector_store %arg8[%26, %c0_16], %25 {strides = array<i32>} : memref<256x16xf32, #tpu.memory_space<vmem>>, vector<256x16xf32>,
    %c1_i32 = arith.constant 1 : i32
    return
  }
  func.func @transform_0(%arg0: i32) -> (i32, i32) {
    %c0_i32 = arith.constant 0 : i32
    %c0_i32_0 = arith.constant 0 : i32
    return %arg0, %c0_i32 : i32, i32
  }
  func.func @transform_1(%arg0: i32) -> (i32, i32) {
    %c0_i32 = arith.constant 0 : i32
    %c0_i32_0 = arith.constant 0 : i32
    %c0_i32_1 = arith.constant 0 : i32
    return %c0_i32, %c0_i32_0 : i32, i32
  }
  func.func @transform_2(%arg0: i32) -> (i32, i32) {
    %c0_i32 = arith.constant 0 : i32
    %c0_i32_0 = arith.constant 0 : i32
    %c0_i32_1 = arith.constant 0 : i32
    return %c0_i32, %c0_i32_0 : i32, i32
  }
  func.func @transform_3(%arg0: i32) -> (i32, i32) {
    %c0_i32 = arith.constant 0 : i32
    %c0_i32_0 = arith.constant 0 : i32
    %c0_i32_1 = arith.constant 0 : i32
    return %c0_i32, %c0_i32_0 : i32, i32
  }
  func.func @transform_4(%arg0: i32) -> (i32, i32) {
    %c0_i32 = arith.constant 0 : i32
    %c0_i32_0 = arith.constant 0 : i32
    %c0_i32_1 = arith.constant 0 : i32
    return %c0_i32, %c0_i32_0 : i32, i32
  }
  func.func @transform_5(%arg0: i32) -> (i32, i32) {
    %c0_i32 = arith.constant 0 : i32
    %c0_i32_0 = arith.constant 0 : i32
    %c0_i32_1 = arith.constant 0 : i32
    return %c0_i32, %c0_i32_0 : i32, i32
  }
  func.func @transform_6(%arg0: i32) -> (i32, i32) {
    %c0_i32 = arith.constant 0 : i32
    %c0_i32_0 = arith.constant 0 : i32
    %c0_i32_1 = arith.constant 0 : i32
    return %c0_i32, %c0_i32_0 : i32, i32
  }
  func.func @transform_7(%arg0: i32) -> (i32, i32) {
    %c0_i32 = arith.constant 0 : i32
    %c0_i32_0 = arith.constant 0 : i32
    return %arg0, %c0_i32 : i32, i32
  }
}

</mosaic_0001>

<bundles_post_ra>
// kernel: tpu_custom_call.1
= control target key start
LH: loop header
LB: loop body
LE: loop exit
PB: predicated region body
PF: predicated region fallthrough
CT: control target
= control target key end

     0   :  { %s1539_s24 = smov 0   ;;  %s1852_s0 = inlined_call_operand.vmem [shape: f32[512,20], index: 0, kind: input, shape index: {}]   ;;  %s1853_s1 = inlined_call_operand.vmem [shape: bf16[20,64], index: 1, kind: input, shape index: {}]   ;;  %s1854_s2 = inlined_call_operand.vmem [shape: f32[1,64], index: 2, kind: input, shape index: {}]   ;;  %s1855_s3 = inlined_call_operand.vmem [shape: bf16[64,32], index: 3, kind: input, shape index: {}]   ;;  %s1856_s4 = inlined_call_operand.vmem [shape: f32[1,32], index: 4, kind: input, shape index: {}]   ;;  %s1857_s5 = inlined_call_operand.vmem [shape: bf16[32,16], index: 5, kind: input, shape index: {}]   ;;  %s1858_s6 = inlined_call_operand.vmem [shape: f32[1,16], index: 6, kind: input, shape index: {}]   ;;  %s1859_s7 = inlined_call_operand.vmem [shape: f32[512,16], index: 7, kind: output, shape index: {}]  }
   0x1 LB: > { %s1231_s25 = sadd.s32 4294967295, %s1497_s24   ;;  %p1235_p0 = scmp.ge.s32.totalorder %s1497_s24, 1  ;;  %s1497_s24 = sphi %s1539_s24, %s17_s24  }
   0x2   : > { %p238_p1 = scmp.lt.s32.totalorder %s1497_s24, 3 }
   0x4   : > { %p239_p2 = pnand %p1235_p0, %p238_p1 }
   0x5   : > { %v1483_v0 = vld [vmem:[%s1853_s1] sm:$0xff] (!%p239_p2)   ;;  %vm413_vm0 = vcmask (!%p239_p2), 1041408   ;;  %v1484_v1 = vld [vmem:[%s1853_s1 + $0x8] ss:$0 sps:$4 sm:$0x33] (!%p239_p2)   ;;  %s1236_s30 = sshll.u32 (!%p239_p2), %s1231_s25, 5 }
   0x6   : > { %242 = sbr.rel (%p239_p2) target bundleno = 738 (0x2e2), region = 48  ;;  %1357 = vmatprep.subr.bf16.mxu0 (!%p239_p2), %v1483_v0  ;;  %p271_p3 = scmp.lt.s32.totalorder (!%p239_p2), %s1236_s30, 63  ;;  %1469 = vmatprep.subr.bf16.mxu1 (!%p239_p2), %v1483_v0  ;;  %v415_v2 = vsel (!%p239_p2), %vm413_vm0, %v1484_v1, 0  ;;  %v1485_v3 = vld [vmem:[%s1855_s3] sm:$0xff] (!%p239_p2)   ;;  %vm364_vm1 = vcmask (!%p239_p2), 162816   ;;  %v1486_v25 = vld [vmem:[%s1855_s3 + $0x8] sm:$0xff] (!%p239_p2)  }
   0x7   : > { %1358 = vmatpush3.bf16.msra.mxu0 (!%p239_p2), %v1483_v0  ;;  %1471 = vmatpush3.bf16.msra.mxu1 (!%p239_p2), %v1483_v0  ;;  %v1487_v33 = vld [vmem:[%s1855_s3 + $0x10] sm:$0xff] (!%p239_p2)   ;;  %v1488_v54 = vld [vmem:[%s1855_s3 + $0x18] sm:$0xff] (!%p239_p2)   ;;  %v1489_v55 = vld [vmem:[%s1857_s5] sm:$0xff] (!%p239_p2)   ;;  %vm656_vm2 = vcmask (!%p239_p2), 523264   ;;  %vm932_vm3 = vcmask (!%p239_p2), 261120   ;;  %vm1142_vm4 = vcmask (!%p239_p2), 130048  }
   0x8   : > { %1473 = vmatprep.subr.msk.bf16.mxu0 (!%p239_p2), %vm413_vm0, %v1484_v1  ;;  %1474 = vmatprep.subr.msk.bf16.mxu1 (!%p239_p2), %vm413_vm0, %v1484_v1  ;;  %v1490_v56 = vld [vmem:[%s1857_s5 + $0x8] sm:$0xff] (!%p239_p2)   ;;  %v1632_v57 = vld [vmem:[%s1854_s2] ss:$0 sm:$0xff] (!%p239_p2) }
   0xb   : > { %1360 = vmatpush3.bf16.msra.mxu0 (!%p239_p2), %v415_v2  ;;  %1472 = vmatpush3.bf16.msra.mxu1 (!%p239_p2), %v415_v2 }
   0xc   : > { %1393 = vmatprep.subr.bf16.mxu1 (!%p239_p2), %v1485_v3  ;;  %1433 = vmatprep.subr.bf16.mxu0 (!%p239_p2), %v1489_v55 }
   0xd   : > { %s1861_s30 = smov (!%p271_p3, %s1236_s30), 63 }
   0xe   : > { %s1237_s10 = sshll.u32 %s1861_s30, 3 }
   0xf   : > { %s1564_s13 = scalar_lea.vmem %s1852_s0, %s1237_s10  ;;  %s1751_s12 = scalar_lea.vmem %s1859_s7, %s1237_s10 }
  0x10   : > { %v301_v4 = vld [vmem:[%s1564_s13] sm:$0xff]  ;;  %v302_v5 = vld [vmem:[%s1564_s13 + $0x8] sm:$0xff]  ;;  %v303_v6 = vld [vmem:[%s1564_s13 + $0x10] sm:$0xff] }
  0x11   : > { %v333_v7 = vpack.c.bf16 %v302_v5, %v301_v4  ;;  %v304_v8 = vld [vmem:[%s1564_s13 + $0x18] sm:$0xff]  ;;  %v305_v9 = vld [vmem:[%s1564_s13 + $0x20] sm:$0xff]  ;;  %v306_v10 = vld [vmem:[%s1564_s13 + $0x28] sm:$0xff] }
  0x12   : > { %v334_v11 = vpack.c.bf16 %v304_v8, %v303_v6  ;;  %v335_v12 = vpack.c.bf16 %v306_v10, %v305_v9  ;;  %v307_v13 = vld [vmem:[%s1564_s13 + $0x30] sm:$0xff]  ;;  %v308_v14 = vld [vmem:[%s1564_s13 + $0x38] sm:$0xff]  ;;  %v309_v15 = vld [vmem:[%s1564_s13 + $0x40] sm:$0xff] }
  0x13   : > { %1361 = vmatprep.mubr.msk.bf16.mxu0 %vm364_vm1, %v333_v7  ;;  %v310_v16 = vld [vmem:[%s1564_s13 + $0x48] sm:$0xff]  ;;  %v317_v17 = vld [vmem:[%s1564_s13 + $0x80] sm:$0xff]  ;;  %v319_v20 = vld [vmem:[%s1564_s13 + $0x90] sm:$0xff]  ;;  %v336_v26 = vpack.c.bf16 %v308_v14, %v307_v13 }
  0x14   : > { %1362 = vmatmul.mubr.msk.bf16.vlgmr.msra.gmra.mrb[0].mxu0 %vm364_vm1, %v334_v11  ;;  %v318_v18 = vld [vmem:[%s1564_s13 + $0x88] sm:$0xff]  ;;  %v320_v21 = vld [vmem:[%s1564_s13 + $0x98] sm:$0xff]  ;;  %v321_v22 = vld [vmem:[%s1564_s13 + $0xa0] sm:$0xff]  ;;  %v337_v28 = vpack.c.bf16 %v310_v16, %v309_v15 }
  0x15   : > { %1365 = vmatprep.mubr.msk.bf16.mxu0 %vm364_vm1, %v335_v12  ;;  %v341_v19 = vpack.c.bf16 %v318_v18, %v317_v17  ;;  %v342_v23 = vpack.c.bf16 %v320_v21, %v319_v20  ;;  %v322_v24 = vld [vmem:[%s1564_s13 + $0xa8] sm:$0xff]  ;;  %v323_v29 = vld [vmem:[%s1564_s13 + $0xb0] sm:$0xff]  ;;  %v324_v30 = vld [vmem:[%s1564_s13 + $0xb8] sm:$0xff]  ;;  %1434 = vmatpush3.bf16.msra.mxu0 %v1489_v55 }
  0x16   : > { %v343_v27 = vpack.c.bf16 %v322_v24, %v321_v22  ;;  %v325_v31 = vld [vmem:[%s1564_s13 + $0xc0] sm:$0xff]  ;;  %v326_v32 = vld [vmem:[%s1564_s13 + $0xc8] sm:$0xff]  ;;  %v311_v34 = vld [vmem:[%s1564_s13 + $0x50] sm:$0xff]  ;;  %v344_v36 = vpack.c.bf16 %v324_v30, %v323_v29  ;;  %1435 = vmatprep.subr.bf16.mxu0 %v1490_v56 }
  0x17   : > { %1377 = vmatprep.mubr.msk.bf16.mxu1 %vm364_vm1, %v341_v19  ;;  %v312_v35 = vld [vmem:[%s1564_s13 + $0x58] sm:$0xff]  ;;  %v313_v37 = vld [vmem:[%s1564_s13 + $0x60] sm:$0xff]  ;;  %v314_v38 = vld [vmem:[%s1564_s13 + $0x68] sm:$0xff]  ;;  %v345_v39 = vpack.c.bf16 %v326_v32, %v325_v31 }
  0x18   : > { %1378 = vmatmul.mubr.msk.bf16.vlgmr.msra.gmra.mrb[0].mxu1 %vm364_vm1, %v342_v23  ;;  %v338_v40 = vpack.c.bf16 %v312_v35, %v311_v34  ;;  %v339_v41 = vpack.c.bf16 %v314_v38, %v313_v37  ;;  %v327_v42 = vld [vmem:[%s1564_s13 + $0xd0] sm:$0xff]  ;;  %v328_v43 = vld [vmem:[%s1564_s13 + $0xd8] sm:$0xff]  ;;  %v329_v44 = vld [vmem:[%s1564_s13 + $0xe0] sm:$0xff] }
  0x19   : > { %1381 = vmatprep.mubr.msk.bf16.mxu1 %vm364_vm1, %v343_v27  ;;  %1394 = vmatpush3.bf16.msra.mxu1 %v1485_v3  ;;  %v330_v45 = vld [vmem:[%s1564_s13 + $0xe8] sm:$0xff]  ;;  %v315_v46 = vld [vmem:[%s1564_s13 + $0x70] sm:$0xff]  ;;  %v316_v47 = vld [vmem:[%s1564_s13 + $0x78] sm:$0xff]  ;;  %v346_v48 = vpack.c.bf16 %v328_v43, %v327_v42 }
  0x1a   : > { %1395 = vmatprep.subr.bf16.mxu1 %v1486_v25  ;;  %v347_v49 = vpack.c.bf16 %v330_v45, %v329_v44  ;;  %v340_v50 = vpack.c.bf16 %v316_v47, %v315_v46  ;;  %v331_v51 = vld [vmem:[%s1564_s13 + $0xf0] sm:$0xff]  ;;  %v332_v52 = vld [vmem:[%s1564_s13 + $0xf8] sm:$0xff]  ;;  %1436 = vmatpush3.bf16.msra.mxu0 %v1490_v56 }
  0x1b   : > { %v348_v53 = vpack.c.bf16 %v332_v52, %v331_v51 }
  0x1c   : > { %1366 = vmatmul.mubr.msk.bf16.gmra.mrb[4].mxu0 %vm364_vm1, %v336_v26 }
  0x1d   : > { %1369 = vmatprep.mubr.msk.bf16.mxu0 %vm364_vm1, %v337_v28  ;;  %1396 = vmatpush3.bf16.msra.mxu1 %v1486_v25 }
  0x1e   : > { %1397 = vmatprep.subr.bf16.mxu1 %v1487_v33 }
  0x20   : > { %1382 = vmatmul.mubr.msk.bf16.gmra.mrb[4].mxu1 %vm364_vm1, %v344_v36 }
  0x21   : > { %1385 = vmatprep.mubr.msk.bf16.mxu1 %vm364_vm1, %v345_v39  ;;  %1398 = vmatpush3.bf16.msra.mxu1 %v1487_v33 }
  0x22   : > { %1399 = vmatprep.subr.bf16.mxu1 %v1488_v54 }
  0x24   : > { %1370 = vmatmul.mubr.msk.bf16.gmra.mrb[8].mxu0 %vm364_vm1, %v338_v40 }
  0x25   : > { %1373 = vmatprep.mubr.msk.bf16.mxu0 %vm364_vm1, %v339_v41  ;;  %1400 = vmatpush3.bf16.msra.mxu1 %v1488_v54 }
  0x28   : > { %1386 = vmatmul.mubr.msk.bf16.gmra.mrb[8].mxu1 %vm364_vm1, %v346_v48 }
  0x29   : > { %1389 = vmatprep.mubr.msk.bf16.mxu1 %vm364_vm1, %v347_v49 }
  0x2c   : > { %1374 = vmatmul.mubr.msk.bf16.gmra.mrb[12].mxu0 %vm364_vm1, %v340_v50 }
  0x30   : > { %1390 = vmatmul.mubr.msk.bf16.gmra.mrb[12].mxu1 %vm364_vm1, %v348_v53 }
  0xe7   : > { %v1363_v58 = vpop.f32.mrb[0].mxu0 }
  0xe8   : > { %v460_v59 = vadd.f32 %v1363_v58, %v1632_v57  ;;  %v451_v60 = vpop.f32.mrb[1].mxu0 }
  0xe9   : > { %v452_v61 = vadd.f32 %v1632_v57, %v451_v60  ;;  %v1364_v62 = vpop.f32.mrb[2].mxu0 }
  0xea   : > { %v463_v63 = vadd.f32 %v1364_v62, %v1632_v57  ;;  %v454_v0 = vpop.f32.mrb[3].mxu0  ;;  %v580_v2 = vmax.f32 %v460_v59, 0.0 }
  0xeb   : > { %v455_v1 = vadd.f32 %v1632_v57, %v454_v0  ;;  %v1379_v4 = vpop.f32.mrb[0].mxu1  ;;  %v578_v5 = vmax.f32 %v452_v61, 0.0 }
  0xec   : > { %v581_v3 = vmax.f32 %v463_v63, 0.0  ;;  %v524_v7 = vadd.f32 %v1379_v4, %v1632_v57  ;;  %v515_v8 = vpop.f32.mrb[1].mxu1 }
  0xed   : > { %v579_v6 = vmax.f32 %v455_v1, 0.0  ;;  %v516_v10 = vadd.f32 %v1632_v57, %v515_v8  ;;  %v1380_v11 = vpop.f32.mrb[2].mxu1 }
  0xee   : > { %v611_v9 = vpack.c.bf16 %v581_v3, %v580_v2  ;;  %v596_v14 = vmax.f32 %v524_v7, 0.0  ;;  %v527_v15 = vadd.f32 %v1380_v11, %v1632_v57  ;;  %v518_v16 = vpop.f32.mrb[3].mxu1 }
  0xef   : > { %v610_v12 = vpack.c.bf16 %v579_v6, %v578_v5  ;;  %v1367_v13 = vpop.f32.mrb[4].mxu0  ;;  %v594_v19 = vmax.f32 %v516_v10, 0.0  ;;  %v519_v20 = vadd.f32 %v1632_v57, %v518_v16 }
  0xf0   : > { %v476_v17 = vadd.f32 %v1367_v13, %v1632_v57  ;;  %v467_v18 = vpop.f32.mrb[5].mxu0  ;;  %v597_v23 = vmax.f32 %v527_v15, 0.0 }
  0xf1   : > { %v468_v21 = vadd.f32 %v1632_v57, %v467_v18  ;;  %v1368_v22 = vpop.f32.mrb[6].mxu0  ;;  %1401 = vmatprep.mubr.msk.bf16.mxu1 %vm656_vm2, %v610_v12  ;;  %v595_v26 = vmax.f32 %v519_v20, 0.0 }
  0xf2   : > { %v479_v24 = vadd.f32 %v1368_v22, %v1632_v57  ;;  %v470_v25 = vpop.f32.mrb[7].mxu0  ;;  %1402 = vmatmul.mubr.msk.bf16.vlgmr.msra.gmra.mrb[16].mxu1 %vm656_vm2, %v611_v9  ;;  %v1648_v28 = vpack.c.bf16 %v597_v23, %v596_v14  ;;  %v584_v29 = vmax.f32 %v476_v17, 0.0 }
  0xf3   : > { %v471_v27 = vadd.f32 %v1632_v57, %v470_v25  ;;  %v1650_v31 = vpack.c.bf16 %v595_v26, %v594_v19  ;;  %v1383_v32 = vpop.f32.mrb[4].mxu1  ;;  %v582_v33 = vmax.f32 %v468_v21, 0.0 }
  0xf4   : > { %v585_v30 = vmax.f32 %v479_v24, 0.0  ;;  %v540_v35 = vadd.f32 %v1383_v32, %v1632_v57  ;;  %v531_v36 = vpop.f32.mrb[5].mxu1 }
  0xf5   : > { %v583_v34 = vmax.f32 %v471_v27, 0.0  ;;  %v532_v38 = vadd.f32 %v1632_v57, %v531_v36  ;;  %v1384_v39 = vpop.f32.mrb[6].mxu1 }
  0xf6   : > { %v613_v37 = vpack.c.bf16 %v585_v30, %v584_v29  ;;  %v600_v42 = vmax.f32 %v540_v35, 0.0  ;;  %v543_v43 = vadd.f32 %v1384_v39, %v1632_v57  ;;  %v534_v44 = vpop.f32.mrb[7].mxu1 }
  0xf7   : > { %v612_v40 = vpack.c.bf16 %v583_v34, %v582_v33  ;;  %v1371_v41 = vpop.f32.mrb[8].mxu0  ;;  %v598_v47 = vmax.f32 %v532_v38, 0.0  ;;  %v535_v48 = vadd.f32 %v1632_v57, %v534_v44 }
  0xf8   : > { %v492_v45 = vadd.f32 %v1371_v41, %v1632_v57  ;;  %v483_v46 = vpop.f32.mrb[9].mxu0  ;;  %v601_v51 = vmax.f32 %v543_v43, 0.0 }
  0xf9   : > { %v484_v49 = vadd.f32 %v1632_v57, %v483_v46  ;;  %v1372_v50 = vpop.f32.mrb[10].mxu0  ;;  %1405 = vmatprep.mubr.msk.bf16.mxu1 %vm656_vm2, %v612_v40  ;;  %v599_v54 = vmax.f32 %v535_v48, 0.0 }
  0xfa   : > { %v495_v52 = vadd.f32 %v1372_v50, %v1632_v57  ;;  %v486_v53 = vpop.f32.mrb[11].mxu0  ;;  %1406 = vmatmul.mubr.msk.bf16.gmra.mrb[20].mxu1 %vm656_vm2, %v613_v37  ;;  %v621_v56 = vpack.c.bf16 %v601_v51, %v600_v42  ;;  %v588_v58 = vmax.f32 %v492_v45, 0.0 }
  0xfb   : > { %v487_v55 = vadd.f32 %v1632_v57, %v486_v53  ;;  %v620_v60 = vpack.c.bf16 %v599_v54, %v598_v47  ;;  %v1387_v61 = vpop.f32.mrb[8].mxu1  ;;  %v586_v62 = vmax.f32 %v484_v49, 0.0 }
  0xfc   : > { %v589_v59 = vmax.f32 %v495_v52, 0.0  ;;  %v556_v0 = vadd.f32 %v1387_v61, %v1632_v57  ;;  %v547_v1 = vpop.f32.mrb[9].mxu1 }
  0xfd   : > { %v587_v63 = vmax.f32 %v487_v55, 0.0  ;;  %v548_v3 = vadd.f32 %v1632_v57, %v547_v1  ;;  %v1388_v4 = vpop.f32.mrb[10].mxu1 }
  0xfe   : > { %v615_v2 = vpack.c.bf16 %v589_v59, %v588_v58  ;;  %v604_v7 = vmax.f32 %v556_v0, 0.0  ;;  %v559_v8 = vadd.f32 %v1388_v4, %v1632_v57  ;;  %v550_v9 = vpop.f32.mrb[11].mxu1 }
  0xff   : > { %v614_v5 = vpack.c.bf16 %v587_v63, %v586_v62  ;;  %v1375_v6 = vpop.f32.mrb[12].mxu0  ;;  %v602_v12 = vmax.f32 %v548_v3, 0.0  ;;  %v551_v13 = vadd.f32 %v1632_v57, %v550_v9 }
 0x100   : > { %v508_v10 = vadd.f32 %v1375_v6, %v1632_v57  ;;  %v499_v11 = vpop.f32.mrb[13].mxu0  ;;  %v605_v16 = vmax.f32 %v559_v8, 0.0 }
 0x101   : > { %v500_v14 = vadd.f32 %v1632_v57, %v499_v11  ;;  %v1376_v15 = vpop.f32.mrb[14].mxu0  ;;  %1409 = vmatprep.mubr.msk.bf16.mxu1 %vm656_vm2, %v614_v5  ;;  %v603_v19 = vmax.f32 %v551_v13, 0.0 }
 0x102   : > { %v511_v17 = vadd.f32 %v1376_v15, %v1632_v57  ;;  %v502_v18 = vpop.f32.mrb[15].mxu0  ;;  %1410 = vmatmul.mubr.msk.bf16.gmra.mrb[24].mxu1 %vm656_vm2, %v615_v2  ;;  %v623_v21 = vpack.c.bf16 %v605_v16, %v604_v7  ;;  %v592_v22 = vmax.f32 %v508_v10, 0.0 }
 0x103   : > { %v503_v20 = vadd.f32 %v1632_v57, %v502_v18  ;;  %v622_v24 = vpack.c.bf16 %v603_v19, %v602_v12  ;;  %v1391_v25 = vpop.f32.mrb[12].mxu1  ;;  %v590_v26 = vmax.f32 %v500_v14, 0.0 }
 0x104   : > { %v593_v23 = vmax.f32 %v511_v17, 0.0  ;;  %v572_v29 = vadd.f32 %v1391_v25, %v1632_v57  ;;  %v563_v30 = vpop.f32.mrb[13].mxu1 }
 0x105   : > { %v591_v27 = vmax.f32 %v503_v20, 0.0  ;;  %v564_v33 = vadd.f32 %v1632_v57, %v563_v30  ;;  %v1392_v34 = vpop.f32.mrb[14].mxu1 }
 0x106   : > { %v617_v32 = vpack.c.bf16 %v593_v23, %v592_v22  ;;  %v608_v36 = vmax.f32 %v572_v29, 0.0  ;;  %v575_v37 = vadd.f32 %v1392_v34, %v1632_v57  ;;  %v566_v38 = vpop.f32.mrb[15].mxu1 }
 0x107   : > { %v616_v35 = vpack.c.bf16 %v591_v27, %v590_v26  ;;  %v606_v39 = vmax.f32 %v564_v33, 0.0  ;;  %v567_v40 = vadd.f32 %v1632_v57, %v566_v38  ;;  %v1691_v57 = vld [vmem:[%s1856_s4] ss:$0 sm:$0xff] }
 0x108   : > { %v609_v41 = vmax.f32 %v575_v37, 0.0 }
 0x109   : > { %1413 = vmatprep.mubr.msk.bf16.mxu1 %vm656_vm2, %v616_v35  ;;  %v607_v42 = vmax.f32 %v567_v40, 0.0 }
 0x10a   : > { %1414 = vmatmul.mubr.msk.bf16.gmra.mrb[28].mxu1 %vm656_vm2, %v617_v32  ;;  %v625_v43 = vpack.c.bf16 %v609_v41, %v608_v36 }
 0x10b   : > { %1417 = vmatprep.mubr.msk.bf16.mxu1 %vm656_vm2, %v1650_v31  ;;  %v624_v44 = vpack.c.bf16 %v607_v42, %v606_v39 }
 0x112   : > { %1418 = vmatmul.mubr.msk.bf16.gmra.mrb[32].mxu1 %vm656_vm2, %v1648_v28 }
 0x113   : > { %1421 = vmatprep.mubr.msk.bf16.mxu1 %vm656_vm2, %v620_v60 }
 0x11a   : > { %1422 = vmatmul.mubr.msk.bf16.gmra.mrb[36].mxu1 %vm656_vm2, %v621_v56 }
 0x11b   : > { %1425 = vmatprep.mubr.msk.bf16.mxu1 %vm656_vm2, %v622_v24 }
 0x122   : > { %1426 = vmatmul.mubr.msk.bf16.gmra.mrb[40].mxu1 %vm656_vm2, %v623_v21 }
 0x123   : > { %1429 = vmatprep.mubr.msk.bf16.mxu1 %vm656_vm2, %v624_v44 }
 0x12a   : > { %1430 = vmatmul.mubr.msk.bf16.gmra.mrb[44].mxu1 %vm656_vm2, %v625_v43 }
 0x1c5   : > { %v1403_v31 = vpop.f32.mrb[16].mxu1 }
 0x1c6   : > { %v748_v28 = vadd.f32 %v1403_v31, %v1691_v57  ;;  %v739_v45 = vpop.f32.mrb[17].mxu1 }
 0x1c7   : > { %v740_v46 = vadd.f32 %v1691_v57, %v739_v45  ;;  %v1404_v47 = vpop.f32.mrb[18].mxu1 }
 0x1c8   : > { %v751_v48 = vadd.f32 %v1404_v47, %v1691_v57  ;;  %v742_v49 = vpop.f32.mrb[19].mxu1  ;;  %v868_v51 = vmax.f32 %v748_v28, 0.0 }
 0x1c9   : > { %v743_v50 = vadd.f32 %v1691_v57, %v742_v49  ;;  %v866_v53 = vmax.f32 %v740_v46, 0.0 }
 0x1ca   : > { %v869_v52 = vmax.f32 %v751_v48, 0.0 }
 0x1cb   : > { %v867_v54 = vmax.f32 %v743_v50, 0.0 }
 0x1cc   : > { %v899_v55 = vpack.c.bf16 %v869_v52, %v868_v51 }
 0x1cd   : > { %v898_v56 = vpack.c.bf16 %v867_v54, %v866_v53  ;;  %v1407_v58 = vpop.f32.mrb[20].mxu1 }
 0x1ce   : > { %v764_v59 = vadd.f32 %v1407_v58, %v1691_v57  ;;  %v755_v60 = vpop.f32.mrb[21].mxu1 }
 0x1cf   : > { %v756_v61 = vadd.f32 %v1691_v57, %v755_v60  ;;  %v1408_v62 = vpop.f32.mrb[22].mxu1  ;;  %1437 = vmatprep.mubr.msk.bf16.mxu0 %vm932_vm3, %v898_v56 }
 0x1d0   : > { %v767_v63 = vadd.f32 %v1408_v62, %v1691_v57  ;;  %v758_v0 = vpop.f32.mrb[23].mxu1  ;;  %1438 = vmatmul.mubr.msk.bf16.vlgmr.msra.gmra.mrb[16].mxu0 %vm932_vm3, %v899_v55  ;;  %v872_v2 = vmax.f32 %v764_v59, 0.0 }
 0x1d1   : > { %v759_v1 = vadd.f32 %v1691_v57, %v758_v0  ;;  %v870_v4 = vmax.f32 %v756_v61, 0.0 }
 0x1d2   : > { %v873_v3 = vmax.f32 %v767_v63, 0.0 }
 0x1d3   : > { %v871_v5 = vmax.f32 %v759_v1, 0.0 }
 0x1d4   : > { %v901_v6 = vpack.c.bf16 %v873_v3, %v872_v2 }
 0x1d5   : > { %v900_v7 = vpack.c.bf16 %v871_v5, %v870_v4  ;;  %v1411_v8 = vpop.f32.mrb[24].mxu1 }
 0x1d6   : > { %v780_v9 = vadd.f32 %v1411_v8, %v1691_v57  ;;  %v771_v10 = vpop.f32.mrb[25].mxu1 }
 0x1d7   : > { %v772_v11 = vadd.f32 %v1691_v57, %v771_v10  ;;  %v1412_v12 = vpop.f32.mrb[26].mxu1  ;;  %1441 = vmatprep.mubr.msk.bf16.mxu0 %vm932_vm3, %v900_v7 }
 0x1d8   : > { %v783_v13 = vadd.f32 %v1412_v12, %v1691_v57  ;;  %v774_v14 = vpop.f32.mrb[27].mxu1  ;;  %1442 = vmatmul.mubr.msk.bf16.gmra.mrb[20].mxu0 %vm932_vm3, %v901_v6  ;;  %v876_v16 = vmax.f32 %v780_v9, 0.0 }
 0x1d9   : > { %v775_v15 = vadd.f32 %v1691_v57, %v774_v14  ;;  %v874_v18 = vmax.f32 %v772_v11, 0.0 }
 0x1da   : > { %v877_v17 = vmax.f32 %v783_v13, 0.0 }
 0x1db   : > { %v875_v19 = vmax.f32 %v775_v15, 0.0 }
 0x1dc   : > { %v903_v20 = vpack.c.bf16 %v877_v17, %v876_v16 }
 0x1dd   : > { %v902_v21 = vpack.c.bf16 %v875_v19, %v874_v18  ;;  %v1415_v22 = vpop.f32.mrb[28].mxu1 }
 0x1de   : > { %v796_v23 = vadd.f32 %v1415_v22, %v1691_v57  ;;  %v787_v24 = vpop.f32.mrb[29].mxu1 }
 0x1df   : > { %v788_v25 = vadd.f32 %v1691_v57, %v787_v24  ;;  %v1416_v26 = vpop.f32.mrb[30].mxu1  ;;  %1445 = vmatprep.mubr.msk.bf16.mxu0 %vm932_vm3, %v902_v21 }
 0x1e0   : > { %v799_v27 = vadd.f32 %v1416_v26, %v1691_v57  ;;  %v790_v29 = vpop.f32.mrb[31].mxu1  ;;  %1446 = vmatmul.mubr.msk.bf16.gmra.mrb[24].mxu0 %vm932_vm3, %v903_v20  ;;  %v880_v32 = vmax.f32 %v796_v23, 0.0 }
 0x1e1   : > { %v791_v30 = vadd.f32 %v1691_v57, %v790_v29  ;;  %v878_v34 = vmax.f32 %v788_v25, 0.0 }
 0x1e2   : > { %v881_v33 = vmax.f32 %v799_v27, 0.0 }
 0x1e3   : > { %v879_v35 = vmax.f32 %v791_v30, 0.0  ;;  %v1744_v30 = vld [vmem:[%s1858_s6] ss:$0 sm:$0xff] }
 0x1e4   : > { %v905_v36 = vpack.c.bf16 %v881_v33, %v880_v32 }
 0x1e5   : > { %v904_v37 = vpack.c.bf16 %v879_v35, %v878_v34  ;;  %v1419_v38 = vpop.f32.mrb[32].mxu1 }
 0x1e6   : > { %v812_v39 = vadd.f32 %v1419_v38, %v1691_v57  ;;  %v803_v40 = vpop.f32.mrb[33].mxu1 }
 0x1e7   : > { %v804_v41 = vadd.f32 %v1691_v57, %v803_v40  ;;  %v1420_v42 = vpop.f32.mrb[34].mxu1  ;;  %1449 = vmatprep.mubr.msk.bf16.mxu0 %vm932_vm3, %v904_v37 }
 0x1e8   : > { %v815_v43 = vadd.f32 %v1420_v42, %v1691_v57  ;;  %v806_v44 = vpop.f32.mrb[35].mxu1  ;;  %1450 = vmatmul.mubr.msk.bf16.gmra.mrb[28].mxu0 %vm932_vm3, %v905_v36  ;;  %v884_v28 = vmax.f32 %v812_v39, 0.0 }
 0x1e9   : > { %v807_v31 = vadd.f32 %v1691_v57, %v806_v44  ;;  %v882_v46 = vmax.f32 %v804_v41, 0.0 }
 0x1ea   : > { %v885_v45 = vmax.f32 %v815_v43, 0.0 }
 0x1eb   : > { %v883_v47 = vmax.f32 %v807_v31, 0.0 }
 0x1ec   : > { %v907_v48 = vpack.c.bf16 %v885_v45, %v884_v28 }
 0x1ed   : > { %v906_v49 = vpack.c.bf16 %v883_v47, %v882_v46  ;;  %v1423_v50 = vpop.f32.mrb[36].mxu1 }
 0x1ee   : > { %v828_v51 = vadd.f32 %v1423_v50, %v1691_v57  ;;  %v819_v52 = vpop.f32.mrb[37].mxu1 }
 0x1ef   : > { %v820_v53 = vadd.f32 %v1691_v57, %v819_v52  ;;  %v1424_v54 = vpop.f32.mrb[38].mxu1  ;;  %1453 = vmatprep.mubr.msk.bf16.mxu0 %vm932_vm3, %v906_v49 }
 0x1f0   : > { %v831_v55 = vadd.f32 %v1424_v54, %v1691_v57  ;;  %v822_v56 = vpop.f32.mrb[39].mxu1  ;;  %1454 = vmatmul.mubr.msk.bf16.gmra.mrb[32].mxu0 %vm932_vm3, %v907_v48  ;;  %v888_v59 = vmax.f32 %v828_v51, 0.0 }
 0x1f1   : > { %v823_v58 = vadd.f32 %v1691_v57, %v822_v56  ;;  %v886_v61 = vmax.f32 %v820_v53, 0.0 }
 0x1f2   : > { %v889_v60 = vmax.f32 %v831_v55, 0.0 }
 0x1f3   : > { %v887_v62 = vmax.f32 %v823_v58, 0.0 }
 0x1f4   : > { %v909_v63 = vpack.c.bf16 %v889_v60, %v888_v59 }
 0x1f5   : > { %v908_v0 = vpack.c.bf16 %v887_v62, %v886_v61  ;;  %v1427_v1 = vpop.f32.mrb[40].mxu1 }
 0x1f6   : > { %v844_v2 = vadd.f32 %v1427_v1, %v1691_v57  ;;  %v835_v3 = vpop.f32.mrb[41].mxu1 }
 0x1f7   : > { %v836_v4 = vadd.f32 %v1691_v57, %v835_v3  ;;  %v1428_v5 = vpop.f32.mrb[42].mxu1  ;;  %1457 = vmatprep.mubr.msk.bf16.mxu0 %vm932_vm3, %v908_v0 }
 0x1f8   : > { %v847_v6 = vadd.f32 %v1428_v5, %v1691_v57  ;;  %v838_v7 = vpop.f32.mrb[43].mxu1  ;;  %1458 = vmatmul.mubr.msk.bf16.gmra.mrb[36].mxu0 %vm932_vm3, %v909_v63  ;;  %v892_v9 = vmax.f32 %v844_v2, 0.0 }
 0x1f9   : > { %v839_v8 = vadd.f32 %v1691_v57, %v838_v7  ;;  %v890_v11 = vmax.f32 %v836_v4, 0.0 }
 0x1fa   : > { %v893_v10 = vmax.f32 %v847_v6, 0.0 }
 0x1fb   : > { %v891_v12 = vmax.f32 %v839_v8, 0.0 }
 0x1fc   : > { %v911_v13 = vpack.c.bf16 %v893_v10, %v892_v9 }
 0x1fd   : > { %v910_v14 = vpack.c.bf16 %v891_v12, %v890_v11  ;;  %v1431_v15 = vpop.f32.mrb[44].mxu1 }
 0x1fe   : > { %v860_v16 = vadd.f32 %v1431_v15, %v1691_v57  ;;  %v851_v17 = vpop.f32.mrb[45].mxu1 }
 0x1ff   : > { %v852_v18 = vadd.f32 %v1691_v57, %v851_v17  ;;  %v1432_v19 = vpop.f32.mrb[46].mxu1  ;;  %1461 = vmatprep.mubr.msk.bf16.mxu0 %vm932_vm3, %v910_v14 }
 0x200   : > { %v863_v20 = vadd.f32 %v1432_v19, %v1691_v57  ;;  %v854_v21 = vpop.f32.mrb[47].mxu1  ;;  %1462 = vmatmul.mubr.msk.bf16.gmra.mrb[40].mxu0 %vm932_vm3, %v911_v13  ;;  %v896_v23 = vmax.f32 %v860_v16, 0.0 }
 0x201   : > { %v855_v22 = vadd.f32 %v1691_v57, %v854_v21  ;;  %v894_v25 = vmax.f32 %v852_v18, 0.0 }
 0x202   : > { %v897_v24 = vmax.f32 %v863_v20, 0.0 }
 0x203   : > { %v895_v26 = vmax.f32 %v855_v22, 0.0 }
 0x204   : > { %v913_v27 = vpack.c.bf16 %v897_v24, %v896_v23 }
 0x205   : > { %v912_v29 = vpack.c.bf16 %v895_v26, %v894_v25 }
 0x207   : > { %1465 = vmatprep.mubr.msk.bf16.mxu0 %vm932_vm3, %v912_v29 }
 0x208   : > { %1466 = vmatmul.mubr.msk.bf16.gmra.mrb[44].mxu0 %vm932_vm3, %v913_v27 }
 0x2a3   : > { %v1439_v57 = vpop.f32.mrb[16].mxu0 }
 0x2a4   : > { %v1024_v32 = vadd.f32 %v1439_v57, %v1744_v30  ;;  %v1015_v33 = vpop.f32.mrb[17].mxu0 }
 0x2a5   : > { %v1016_v34 = vadd.f32 %v1744_v30, %v1015_v33  ;;  %v1440_v35 = vpop.f32.mrb[18].mxu0 }
 0x2a6   : > { %1145 = vst.msk [vmem:[%s1751_s12 + $0x10] sm:$0xff] %vm1142_vm4, %v1024_v32  ;;  %v1027_v36 = vadd.f32 %v1440_v35, %v1744_v30  ;;  %v1018_v37 = vpop.f32.mrb[19].mxu0 }
 0x2a7   : > { %1143 = vst.msk [vmem:[%s1751_s12] sm:$0xff] %vm1142_vm4, %v1016_v34  ;;  %v1019_v38 = vadd.f32 %v1744_v30, %v1018_v37 }
 0x2a8   : > { %1146 = vst.msk [vmem:[%s1751_s12 + $0x18] sm:$0xff] %vm1142_vm4, %v1027_v36 }
 0x2a9   : > { %1144 = vst.msk [vmem:[%s1751_s12 + $0x8] sm:$0xff] %vm1142_vm4, %v1019_v38 }
 0x2ab   : > { %v1443_v39 = vpop.f32.mrb[20].mxu0 }
 0x2ac   : > { %v1040_v40 = vadd.f32 %v1443_v39, %v1744_v30  ;;  %v1031_v41 = vpop.f32.mrb[21].mxu0 }
 0x2ad   : > { %v1032_v42 = vadd.f32 %v1744_v30, %v1031_v41  ;;  %v1444_v43 = vpop.f32.mrb[22].mxu0 }
 0x2ae   : > { %1149 = vst.msk [vmem:[%s1751_s12 + $0x30] sm:$0xff] %vm1142_vm4, %v1040_v40  ;;  %v1043_v44 = vadd.f32 %v1444_v43, %v1744_v30  ;;  %v1034_v31 = vpop.f32.mrb[23].mxu0 }
 0x2af   : > { %1147 = vst.msk [vmem:[%s1751_s12 + $0x20] sm:$0xff] %vm1142_vm4, %v1032_v42  ;;  %v1035_v28 = vadd.f32 %v1744_v30, %v1034_v31 }
 0x2b0   : > { %1150 = vst.msk [vmem:[%s1751_s12 + $0x38] sm:$0xff] %vm1142_vm4, %v1043_v44 }
 0x2b1   : > { %1148 = vst.msk [vmem:[%s1751_s12 + $0x28] sm:$0xff] %vm1142_vm4, %v1035_v28 }
 0x2b3   : > { %v1447_v45 = vpop.f32.mrb[24].mxu0 }
 0x2b4   : > { %v1056_v46 = vadd.f32 %v1447_v45, %v1744_v30  ;;  %v1047_v47 = vpop.f32.mrb[25].mxu0 }
 0x2b5   : > { %v1048_v48 = vadd.f32 %v1744_v30, %v1047_v47  ;;  %v1448_v49 = vpop.f32.mrb[26].mxu0 }
 0x2b6   : > { %1153 = vst.msk [vmem:[%s1751_s12 + $0x50] sm:$0xff] %vm1142_vm4, %v1056_v46  ;;  %v1059_v50 = vadd.f32 %v1448_v49, %v1744_v30  ;;  %v1050_v51 = vpop.f32.mrb[27].mxu0 }
 0x2b7   : > { %1151 = vst.msk [vmem:[%s1751_s12 + $0x40] sm:$0xff] %vm1142_vm4, %v1048_v48  ;;  %v1051_v52 = vadd.f32 %v1744_v30, %v1050_v51 }
 0x2b8   : > { %1154 = vst.msk [vmem:[%s1751_s12 + $0x58] sm:$0xff] %vm1142_vm4, %v1059_v50 }
 0x2b9   : > { %1152 = vst.msk [vmem:[%s1751_s12 + $0x48] sm:$0xff] %vm1142_vm4, %v1051_v52 }
 0x2bb   : > { %v1451_v53 = vpop.f32.mrb[28].mxu0 }
 0x2bc   : > { %v1072_v54 = vadd.f32 %v1451_v53, %v1744_v30  ;;  %v1063_v55 = vpop.f32.mrb[29].mxu0 }
 0x2bd   : > { %v1064_v56 = vadd.f32 %v1744_v30, %v1063_v55  ;;  %v1452_v58 = vpop.f32.mrb[30].mxu0 }
 0x2be   : > { %1157 = vst.msk [vmem:[%s1751_s12 + $0x70] sm:$0xff] %vm1142_vm4, %v1072_v54  ;;  %v1075_v59 = vadd.f32 %v1452_v58, %v1744_v30  ;;  %v1066_v60 = vpop.f32.mrb[31].mxu0 }
 0x2bf   : > { %1155 = vst.msk [vmem:[%s1751_s12 + $0x60] sm:$0xff] %vm1142_vm4, %v1064_v56  ;;  %v1067_v61 = vadd.f32 %v1744_v30, %v1066_v60 }
 0x2c0   : > { %1158 = vst.msk [vmem:[%s1751_s12 + $0x78] sm:$0xff] %vm1142_vm4, %v1075_v59 }
 0x2c1   : > { %1156 = vst.msk [vmem:[%s1751_s12 + $0x68] sm:$0xff] %vm1142_vm4, %v1067_v61 }
 0x2c3   : > { %v1455_v62 = vpop.f32.mrb[32].mxu0 }
 0x2c4   : > { %v1088_v63 = vadd.f32 %v1455_v62, %v1744_v30  ;;  %v1079_v0 = vpop.f32.mrb[33].mxu0 }
 0x2c5   : > { %v1080_v1 = vadd.f32 %v1744_v30, %v1079_v0  ;;  %v1456_v2 = vpop.f32.mrb[34].mxu0 }
 0x2c6   : > { %1161 = vst.msk [vmem:[%s1751_s12 + $0x90] sm:$0xff] %vm1142_vm4, %v1088_v63  ;;  %v1091_v3 = vadd.f32 %v1456_v2, %v1744_v30  ;;  %v1082_v4 = vpop.f32.mrb[35].mxu0 }
 0x2c7   : > { %1159 = vst.msk [vmem:[%s1751_s12 + $0x80] sm:$0xff] %vm1142_vm4, %v1080_v1  ;;  %v1083_v5 = vadd.f32 %v1744_v30, %v1082_v4 }
 0x2c8   : > { %1162 = vst.msk [vmem:[%s1751_s12 + $0x98] sm:$0xff] %vm1142_vm4, %v1091_v3 }
 0x2c9   : > { %1160 = vst.msk [vmem:[%s1751_s12 + $0x88] sm:$0xff] %vm1142_vm4, %v1083_v5 }
 0x2cb   : > { %v1459_v6 = vpop.f32.mrb[36].mxu0 }
 0x2cc   : > { %v1104_v7 = vadd.f32 %v1459_v6, %v1744_v30  ;;  %v1095_v8 = vpop.f32.mrb[37].mxu0 }
 0x2cd   : > { %v1096_v9 = vadd.f32 %v1744_v30, %v1095_v8  ;;  %v1460_v10 = vpop.f32.mrb[38].mxu0 }
 0x2ce   : > { %1165 = vst.msk [vmem:[%s1751_s12 + $0xb0] sm:$0xff] %vm1142_vm4, %v1104_v7  ;;  %v1107_v11 = vadd.f32 %v1460_v10, %v1744_v30  ;;  %v1098_v12 = vpop.f32.mrb[39].mxu0 }
 0x2cf   : > { %1163 = vst.msk [vmem:[%s1751_s12 + $0xa0] sm:$0xff] %vm1142_vm4, %v1096_v9  ;;  %v1099_v13 = vadd.f32 %v1744_v30, %v1098_v12 }
 0x2d0   : > { %1166 = vst.msk [vmem:[%s1751_s12 + $0xb8] sm:$0xff] %vm1142_vm4, %v1107_v11 }
 0x2d1   : > { %1164 = vst.msk [vmem:[%s1751_s12 + $0xa8] sm:$0xff] %vm1142_vm4, %v1099_v13 }
 0x2d3   : > { %v1463_v14 = vpop.f32.mrb[40].mxu0 }
 0x2d4   : > { %v1120_v15 = vadd.f32 %v1463_v14, %v1744_v30  ;;  %v1111_v16 = vpop.f32.mrb[41].mxu0 }
 0x2d5   : > { %v1112_v17 = vadd.f32 %v1744_v30, %v1111_v16  ;;  %v1464_v18 = vpop.f32.mrb[42].mxu0 }
 0x2d6   : > { %1169 = vst.msk [vmem:[%s1751_s12 + $0xd0] sm:$0xff] %vm1142_vm4, %v1120_v15  ;;  %v1123_v19 = vadd.f32 %v1464_v18, %v1744_v30  ;;  %v1114_v20 = vpop.f32.mrb[43].mxu0 }
 0x2d7   : > { %1167 = vst.msk [vmem:[%s1751_s12 + $0xc0] sm:$0xff] %vm1142_vm4, %v1112_v17  ;;  %v1115_v21 = vadd.f32 %v1744_v30, %v1114_v20 }
 0x2d8   : > { %1170 = vst.msk [vmem:[%s1751_s12 + $0xd8] sm:$0xff] %vm1142_vm4, %v1123_v19 }
 0x2d9   : > { %1168 = vst.msk [vmem:[%s1751_s12 + $0xc8] sm:$0xff] %vm1142_vm4, %v1115_v21 }
 0x2db   : > { %v1467_v22 = vpop.f32.mrb[44].mxu0 }
 0x2dc   : > { %v1136_v23 = vadd.f32 %v1467_v22, %v1744_v30  ;;  %v1127_v24 = vpop.f32.mrb[45].mxu0 }
 0x2dd   : > { %v1128_v25 = vadd.f32 %v1744_v30, %v1127_v24  ;;  %v1468_v26 = vpop.f32.mrb[46].mxu0 }
 0x2de   : > { %1173 = vst.msk [vmem:[%s1751_s12 + $0xf0] sm:$0xff] %vm1142_vm4, %v1136_v23  ;;  %v1139_v27 = vadd.f32 %v1468_v26, %v1744_v30  ;;  %v1130_v29 = vpop.f32.mrb[47].mxu0 }
 0x2df   : > { %1171 = vst.msk [vmem:[%s1751_s12 + $0xe0] sm:$0xff] %vm1142_vm4, %v1128_v25  ;;  %v1131_v57 = vadd.f32 %v1744_v30, %v1130_v29 }
 0x2e0   : > { %1174 = vst.msk [vmem:[%s1751_s12 + $0xf8] sm:$0xff] %vm1142_vm4, %v1139_v27 }
 0x2e1   : > { %1172 = vst.msk [vmem:[%s1751_s12 + $0xe8] sm:$0xff] %vm1142_vm4, %v1131_v57 }
 0x2e2 PF: > { %s17_s24 = sadd.s32 1, %s1497_s24  }
 0x2e3   : > { %p14_p4 = scmp.ge.s32.totalorder %s17_s24, 4  }
 0x2e5   :  { %16 = sbr.rel (!%p14_p4) target bundleno = 1 (0x1), region = 78 }

</bundles_post_ra>
